<compile_context>
chip_gen: v7x
topology: tpu7x:2x2x1
jax: 0.10.0
libtpu: 0.0.40
codegen_flags: <defaults>
</compile_context>

<pallas_src>
import functools

import jax
import jax.numpy as jnp
from jax.experimental import pallas as pl
from jax.experimental.pallas import tpu as pltpu


def _soft_ce_kernel(logits_ref, tgt_ref, *refs, smooth_factor, ignore_index,
                    n_rows, need_row_mask):
    if ignore_index is None:
        loss_ref, psum_ref = refs
        cnt_ref = pcnt_ref = None
    else:
        loss_ref, cnt_ref, psum_ref, pcnt_ref = refs

    c_idx = pl.program_id(0)
    j = pl.program_id(1)
    nj = pl.num_programs(1)

    @pl.when(j == 0)
    def _init():
        psum_ref[...] = jnp.zeros_like(psum_ref)
        if ignore_index is not None:
            pcnt_ref[...] = jnp.zeros_like(pcnt_ref)

    x = logits_ref[...].astype(jnp.float32)              # (TN, C) f32
    t = tgt_ref[...]                                     # (TN, 1) int32
    tn, n_class = x.shape

    # Single-row class iota; the compare broadcasts (1,C) vs (TN,1) -> (TN,C).
    cls = jax.lax.broadcasted_iota(jnp.int32, (1, n_class), 1)
    x_t = jnp.sum(jnp.where(cls == t, x, 0.0), axis=1, keepdims=True)  # (TN,1)

    # log-softmax pieces (class axis = lane axis), no (TN,C) soft/log_prb temps
    m = jnp.max(x, axis=1, keepdims=True)                # (TN, 1)
    lse = jnp.log(jnp.sum(jnp.exp(x - m), axis=1, keepdims=True))
    sum_x = jnp.sum(x, axis=1, keepdims=True)

    a = (smooth_factor / (n_class - 1)) if n_class > 1 else 0.0
    b = (1.0 - smooth_factor) - a
    per_row = -(a * (sum_x - n_class * (m + lse)) + b * (x_t - m - lse))

    # Build the mask only when statically required.
    mask = None
    if need_row_mask:
        row = jax.lax.broadcasted_iota(jnp.int32, (tn, 1), 0)
        tile_start = (c_idx * nj + j) * tn
        mask = (tile_start + row) < n_rows
    if ignore_index is not None:
        valid = (t != ignore_index)
        mask = valid if mask is None else jnp.logical_and(mask, valid)

    if mask is None:
        psum_ref[...] += per_row
    else:
        # SELECT (not multiply): garbage rows of a partial/phantom block may
        # produce inf/NaN through exp/log, but 'where' never lets them reach
        # the accumulator (0*inf would).
        psum_ref[...] += jnp.where(mask, per_row, 0.0)
        if ignore_index is not None:
            pcnt_ref[...] += mask.astype(jnp.float32)

    @pl.when(j == nj - 1)
    def _finalize():
        loss_ref[...] = jnp.sum(psum_ref[...], keepdims=True)[None]
        if ignore_index is not None:
            cnt_ref[...] = jnp.sum(pcnt_ref[...], keepdims=True)[None]


def _device_defaults():
    """(vmem_limit_bytes, f32 working-tile budget, default num_splits)."""
    kind = ""
    try:
        kind = jax.devices()[0].device_kind.lower()
    except Exception:
        pass
    if "v7" in kind:
        # 64 MiB physical VMEM per TC, 2 TCs -> split grid axis 0 across them.
        return 48 * 1024 * 1024, 4 * 1024 * 1024, 2
    if "v5" in kind or "v6" in kind:
        # 128 MiB physical VMEM, single TensorCore.
        return 64 * 1024 * 1024, 8 * 1024 * 1024, 1
    # Unknown chip: conservative (fits a 64 MiB-VMEM part).
    return 48 * 1024 * 1024, 4 * 1024 * 1024, 1


def _pick_tile_n(n_rows, n_class, itemsize, f32_tile_budget):
    # Sublane-pack granularity so narrow dtypes fill their vregs.
    if itemsize >= 4:
        g = 8
    elif itemsize == 2:
        g = 16
    else:
        g = 32
    # Budget the (tile_n, C) f32 working tile; the raw logits DMA block is
    # then tile_n*C*itemsize (MiB-scale for the defaults above). No row cap.
    t = int(f32_tile_budget // (4 * n_class))
    t = max(g, (t // g) * g)
    n_ceil = -(-n_rows // g) * g
    return max(g, min(t, n_ceil))


def soft_crossentropy_pallas(logits, target, *, smooth_factor=0.01,
                             ignore_index=None, reduction='mean',
                             tile_n=None, num_splits=None,
                             vmem_limit_bytes=None):
    """logits: [N, C] float (any dtype, used natively), target: [N] int."""
    N, C = logits.shape
    if N == 0:
        return jnp.float32(0.0)
    if reduction not in ('mean', 'sum'):
        raise NotImplementedError("only reduction='mean'/'sum' supported")

    vmem_default, tile_budget, splits_default = _device_defaults()
    if vmem_limit_bytes is None:
        vmem_limit_bytes = vmem_default

    if tile_n is None:
        tile_n = _pick_tile_n(N, C, jnp.dtype(logits.dtype).itemsize,
                              tile_budget)
    assert tile_n % 8 == 0

    n_tiles = -(-N // tile_n)
    if num_splits is None:
        num_splits = splits_default
    num_splits = max(1, min(int(num_splits), n_tiles))
    tiles_per_split = -(-n_tiles // num_splits)
    covered = num_splits * tiles_per_split * tile_n
    need_row_mask = covered != N
    last_tile = n_tiles - 1

    # No jnp.pad of the logits: partial last block + clamped index for any
    # phantom tiles, with the in-kernel row mask dropping out-of-range rows.
    t2d = target.astype(jnp.int32).reshape(N, 1)

    def row_map(c, j):
        return (jnp.minimum(c * tiles_per_split + j, last_tile), 0)

    kernel = functools.partial(_soft_ce_kernel,
                               smooth_factor=float(smooth_factor),
                               ignore_index=ignore_index,
                               n_rows=N,
                               need_row_mask=need_row_mask)

    part_shape = jax.ShapeDtypeStruct((num_splits, 1, 1), jnp.float32)
    part_spec = pl.BlockSpec((1, 1, 1), lambda c, j: (c, 0, 0))
    if ignore_index is None:
        out_shape = (part_shape,)
        out_specs = [part_spec]
        scratch = [pltpu.VMEM((tile_n, 1), jnp.float32)]
    else:
        out_shape = (part_shape, part_shape)
        out_specs = [part_spec, part_spec]
        scratch = [pltpu.VMEM((tile_n, 1), jnp.float32),
                   pltpu.VMEM((tile_n, 1), jnp.float32)]

    outs = pl.pallas_call(
        kernel,
        out_shape=out_shape,
        grid_spec=pltpu.PrefetchScalarGridSpec(
            num_scalar_prefetch=0,
            grid=(num_splits, tiles_per_split),
            in_specs=[
                pl.BlockSpec((tile_n, C), row_map),
                pl.BlockSpec((tile_n, 1), row_map),
            ],
            out_specs=out_specs,
            scratch_shapes=scratch,
        ),
        compiler_params=pltpu.CompilerParams(
            dimension_semantics=("parallel", "arbitrary"),
            vmem_limit_bytes=vmem_limit_bytes),
    )(logits, t2d)

    loss_sum = jnp.sum(outs[0])
    if ignore_index is None:
        count = jnp.float32(N)
    else:
        count = jnp.sum(outs[1])

    if reduction == 'mean':
        return jnp.where(count > 0, loss_sum / jnp.maximum(count, 1.0),
                         jnp.float32(0.0))
    # reduction == 'sum'
    return jnp.where(count > 0, loss_sum, jnp.float32(0.0))


def _reference(logits, target, smooth_factor=0.01, ignore_index=None,
               reduction='mean'):
    logits = logits.astype(jnp.float32)
    n_class = logits.shape[1]
    if ignore_index is not None:
        valid = (target != ignore_index)
    else:
        valid = jnp.ones(target.shape, dtype=bool)
    one_hot = jax.nn.one_hot(target, n_class, dtype=jnp.float32)
    soft = one_hot * (1 - smooth_factor) + (1 - one_hot) * (
        smooth_factor / (n_class - 1))
    log_prb = jax.nn.log_softmax(logits, axis=1)
    loss = -jnp.sum(soft * log_prb, axis=1) * valid.astype(jnp.float32)
    cnt = jnp.sum(valid)
    if reduction == 'mean':
        return jnp.where(cnt > 0, jnp.sum(loss) / jnp.maximum(cnt, 1), 0.0)
    return jnp.sum(loss)


if __name__ == "__main__":
    key = jax.random.PRNGKey(0)
    k1, k2, k3, k4 = jax.random.split(key, 4)

    # Case 1: f32 logits, no ignore_index, aligned fast path (no mask).
    N1, C1 = 64, 16
    logits1 = jax.random.normal(k1, (N1, C1), dtype=jnp.float32)
    target1 = jax.random.randint(k2, (N1,), 0, C1, dtype=jnp.int32)
    out1 = soft_crossentropy_pallas(logits1, target1, smooth_factor=0.01,
                                    ignore_index=None, reduction='mean')
    out1 = jax.block_until_ready(out1)
    ref1 = _reference(logits1, target1, 0.01, None, 'mean')
    assert jnp.allclose(out1, ref1, rtol=1e-5, atol=1e-5), (out1, ref1)

    # Case 2: bf16 logits, ignore_index set, N not tile-aligned, forced small
    # tile and 3 splits so the partial-block + phantom-tile + mask path runs.
    N2, C2 = 50, 16
    logits2 = jax.random.normal(k3, (N2, C2),
                                dtype=jnp.float32).astype(jnp.bfloat16)
    target2 = jax.random.randint(k4, (N2,), 0, C2, dtype=jnp.int32)
    out2 = soft_crossentropy_pallas(logits2, target2, smooth_factor=0.1,
                                    ignore_index=3, reduction='mean',
                                    tile_n=16, num_splits=3)
    out2 = jax.block_until_ready(out2)
    ref2 = _reference(logits2, target2, 0.1, 3, 'mean')
    assert jnp.allclose(out2, ref2, rtol=1e-4, atol=1e-4), (out2, ref2)

    # Case 3: f32, no ignore_index, auto tiling with N not a multiple of the
    # tile -> partial-block row-mask path without any padding copy.
    out3 = soft_crossentropy_pallas(logits1[:50], target1[:50],
                                    smooth_factor=0.05, reduction='sum')
    out3 = jax.block_until_ready(out3)
    ref3 = _reference(logits1[:50], target1[:50], 0.05, None, 'sum')
    assert jnp.allclose(out3, ref3, rtol=1e-5, atol=1e-5), (out3, ref3)

    print("KERNEL_OK")
</pallas_src>

<mosaic_0001>
module attributes {stable_mosaic.version = 11 : i64} {
  func.func @_soft_ce_kernel(%arg0: i32, %arg1: i32, %arg2: memref<64x16xf32, #tpu.memory_space<vmem>>, %arg3: memref<64x1xi32, #tpu.memory_space<vmem>>, %arg4: memref<1x1x1xf32, #tpu.memory_space<vmem>>, %arg5: memref<64x1xf32, #tpu.memory_space<vmem>>) attributes {dimension_semantics = [#tpu.dimension_semantics<parallel>, #tpu.dimension_semantics<arbitrary>], iteration_bounds = array<i64: 1, 1>, scalar_prefetch = 0 : i64, scratch_operands = 1 : i64, tpu.core_type = #tpu.core_type<tc>, window_params = [{transform_indices = @transform_0, window_bounds = array<i64: 64, 16>}, {transform_indices = @transform_1, window_bounds = array<i64: 64, 1>}, {transform_indices = @transform_2, window_bounds = array<i64: 1, 1, 1>}]} {
    %c0_i32 = arith.constant 0 : i32
    %0 = arith.cmpi eq, %arg1, %c0_i32 : i32
    %1 = arith.extui %0 : i1 to i32
    %c0_i32_0 = arith.constant 0 : i32
    %2 = arith.cmpi ne, %1, %c0_i32_0 : i32
    scf.if %2 {
      %cst_18 = arith.constant 0.000000e+00 : f32
      %42 = vector.broadcast %cst_18 : f32 to vector<64x1xf32>
      %c0_19 = arith.constant 0 : index
      %c0_20 = arith.constant 0 : index
      %43 = vector.load %arg5[%c0_19, %c0_20] : memref<64x1xf32, #tpu.memory_space<vmem>>, vector<64x1xf32>
      tpu.vector_store %arg5[%c0_19, %c0_20], %42 {strides = array<i32>} : memref<64x1xf32, #tpu.memory_space<vmem>>, vector<64x1xf32>,
    } else {
    }
    %c0 = arith.constant 0 : index
    %c0_1 = arith.constant 0 : index
    %3 = vector.load %arg2[%c0, %c0_1] : memref<64x16xf32, #tpu.memory_space<vmem>>, vector<64x16xf32>
    %c0_2 = arith.constant 0 : index
    %c0_3 = arith.constant 0 : index
    %4 = vector.load %arg3[%c0_2, %c0_3] : memref<64x1xi32, #tpu.memory_space<vmem>>, vector<64x1xi32>
    %5 = tpu.iota {dimensions = array<i32: 1>} : vector<1x16xi32>
    %6 = vector.broadcast %5 : vector<1x16xi32> to vector<64x16xi32>
    %7 = vector.broadcast %4 : vector<64x1xi32> to vector<64x16xi32>
    %8 = arith.cmpi eq, %6, %7 : vector<64x16xi32>
    %cst = arith.constant 0.000000e+00 : f32
    %9 = vector.broadcast %cst : f32 to vector<64x16xf32>
    %10 = arith.select %8, %3, %9 : vector<64x16xi1>, vector<64x16xf32>
    %cst_4 = arith.constant dense<0.000000e+00> : vector<64xf32>
    %11 = vector.multi_reduction <add>, %10, %cst_4 [1] : vector<64x16xf32> to vector<64xf32>
    %12 = vector.shape_cast %11 : vector<64xf32> to vector<64x1xf32>
    %cst_5 = arith.constant dense<0xFF800000> : vector<64xf32>
    %13 = vector.multi_reduction <maximumf>, %3, %cst_5 [1] : vector<64x16xf32> to vector<64xf32>
    %14 = vector.shape_cast %13 : vector<64xf32> to vector<64x1xf32>
    %15 = vector.broadcast %14 : vector<64x1xf32> to vector<64x16xf32>
    %16 = arith.subf %3, %15 : vector<64x16xf32>
    %17 = math.exp %16 : vector<64x16xf32>
    %cst_6 = arith.constant dense<0.000000e+00> : vector<64xf32>
    %18 = vector.multi_reduction <add>, %17, %cst_6 [1] : vector<64x16xf32> to vector<64xf32>
    %19 = vector.shape_cast %18 : vector<64xf32> to vector<64x1xf32>
    %20 = math.log %19 : vector<64x1xf32>
    %cst_7 = arith.constant dense<0.000000e+00> : vector<64xf32>
    %21 = vector.multi_reduction <add>, %3, %cst_7 [1] : vector<64x16xf32> to vector<64xf32>
    %22 = vector.shape_cast %21 : vector<64xf32> to vector<64x1xf32>
    %23 = arith.addf %14, %20 : vector<64x1xf32>
    %cst_8 = arith.constant 1.600000e+01 : f32
    %24 = vector.broadcast %cst_8 : f32 to vector<64x1xf32>
    %25 = arith.mulf %24, %23 : vector<64x1xf32>
    %26 = arith.subf %22, %25 : vector<64x1xf32>
    %cst_9 = arith.constant 6.66666659E-4 : f32
    %27 = vector.broadcast %cst_9 : f32 to vector<64x1xf32>
    %28 = arith.mulf %27, %26 : vector<64x1xf32>
    %29 = arith.subf %12, %14 : vector<64x1xf32>
    %30 = arith.subf %29, %20 : vector<64x1xf32>
    %cst_10 = arith.constant 0.989333331 : f32
    %31 = vector.broadcast %cst_10 : f32 to vector<64x1xf32>
    %32 = arith.mulf %31, %30 : vector<64x1xf32>
    %33 = arith.addf %28, %32 : vector<64x1xf32>
    %cst_11 = arith.constant 0.000000e+00 : f32
    %34 = vector.broadcast %cst_11 : f32 to vector<64x1xf32>
    %35 = arith.subf %34, %33 : vector<64x1xf32>
    %c0_12 = arith.constant 0 : index
    %c0_13 = arith.constant 0 : index
    %36 = vector.load %arg5[%c0_12, %c0_13] : memref<64x1xf32, #tpu.memory_space<vmem>>, vector<64x1xf32>
    %37 = arith.addf %36, %35 : vector<64x1xf32>
    %c0_14 = arith.constant 0 : index
    %c0_15 = arith.constant 0 : index
    %38 = vector.load %arg5[%c0_14, %c0_15] : memref<64x1xf32, #tpu.memory_space<vmem>>, vector<64x1xf32>
    tpu.vector_store %arg5[%c0_14, %c0_15], %37 {strides = array<i32>} : memref<64x1xf32, #tpu.memory_space<vmem>>, vector<64x1xf32>,
    %c0_i32_16 = arith.constant 0 : i32
    %39 = arith.cmpi eq, %arg1, %c0_i32_16 : i32
    %40 = arith.extui %39 : i1 to i32
    %c0_i32_17 = arith.constant 0 : i32
    %41 = arith.cmpi ne, %40, %c0_i32_17 : i32
    scf.if %41 {
      %c0_18 = arith.constant 0 : index
      %c0_19 = arith.constant 0 : index
      %42 = vector.load %arg5[%c0_18, %c0_19] : memref<64x1xf32, #tpu.memory_space<vmem>>, vector<64x1xf32>
      %43 = vector.shape_cast %42 : vector<64x1xf32> to vector<1x64x1xf32>
      %cst_20 = arith.constant dense<0.000000e+00> : vector<1xf32>
      %44 = vector.multi_reduction <add>, %43, %cst_20 [1, 2] : vector<1x64x1xf32> to vector<1xf32>
      %45 = vector.shape_cast %44 : vector<1xf32> to vector<1x1x1xf32>
      %46 = vector.extract %45[0, 0, 0] : f32 from vector<1x1x1xf32>
      %47 = vector.broadcast %46 : f32 to vector<1x1xf32>
      %48 = vector.shape_cast %47 : vector<1x1xf32> to vector<1x1x1xf32>
      %c0_21 = arith.constant 0 : index
      %c0_22 = arith.constant 0 : index
      %c0_23 = arith.constant 0 : index
      %49 = vector.load %arg4[%c0_21, %c0_22, %c0_23] : memref<1x1x1xf32, #tpu.memory_space<vmem>>, vector<1x1x1xf32>
      tpu.vector_store %arg4[%c0_21, %c0_22, %c0_23], %48 {strides = array<i32>} : memref<1x1x1xf32, #tpu.memory_space<vmem>>, vector<1x1x1xf32>,
    } else {
    }
    return
  }
  func.func @transform_0(%arg0: i32, %arg1: i32) -> (i32, i32) {
    %c1_i32 = arith.constant 1 : i32
    %0 = arith.muli %arg0, %c1_i32 : i32
    %1 = arith.addi %0, %arg1 : i32
    %c0_i32 = arith.constant 0 : i32
    %2 = arith.minsi %1, %c0_i32 : i32
    %c0_i32_0 = arith.constant 0 : i32
    %c0_i32_1 = arith.constant 0 : i32
    return %2, %c0_i32_0 : i32, i32
  }
  func.func @transform_1(%arg0: i32, %arg1: i32) -> (i32, i32) {
    %c1_i32 = arith.constant 1 : i32
    %0 = arith.muli %arg0, %c1_i32 : i32
    %1 = arith.addi %0, %arg1 : i32
    %c0_i32 = arith.constant 0 : i32
    %2 = arith.minsi %1, %c0_i32 : i32
    %c0_i32_0 = arith.constant 0 : i32
    %c0_i32_1 = arith.constant 0 : i32
    return %2, %c0_i32_0 : i32, i32
  }
  func.func @transform_2(%arg0: i32, %arg1: i32) -> (i32, i32, i32) {
    %c0_i32 = arith.constant 0 : i32
    %c0_i32_0 = arith.constant 0 : i32
    %c0_i32_1 = arith.constant 0 : i32
    return %arg0, %c0_i32, %c0_i32_0 : i32, i32, i32
  }
}

</mosaic_0001>

<bundles_post_ra>
// kernel: tpu_custom_call.1
= control target key start
LH: loop header
LB: loop body
LE: loop exit
PB: predicated region body
PF: predicated region fallthrough
CT: control target
= control target key end

     0   :  { %vm147_vm0 = vcmask 130048   ;;  %v508_v6 = vmov 0   ;;  %s740_s0 = inlined_call_operand.vmem [shape: f32[64,16], index: 0, kind: input, shape index: {}]   ;;  %s741_s1 = inlined_call_operand.vmem [shape: s32[64,1], index: 1, kind: input, shape index: {}]   ;;  %s742_s2 = inlined_call_operand.hbm [shape: f32[1,1,1], index: 2, kind: output, shape index: {}]  }
   0x1   :  { %v529_v0 = vld [vmem:[%s740_s0 + $0x10] sm:$0xff]  ;;  %v534_v1 = vld [vmem:[%s740_s0] sm:$0xff]  ;;  %v539_v2 = vld [vmem:[%s740_s0 + $0x18] sm:$0xff]  ;;  %451 = vset.pattern.permute.xlu1 %v508_v6  ;;  %450 = vset.pattern.permute.xlu0 %v508_v6 }
   0x2   :  { %v178_v3 = vsel %vm147_vm0, %v529_v0, -inf  ;;  %v172_v4 = vsel %vm147_vm0, %v534_v1, -inf  ;;  %v548_v5 = vld [vmem:[%s740_s0 + $0x8] sm:$0xff]  ;;  %v181_v7 = vsel %vm147_vm0, %v539_v2, -inf  ;;  %v562_v10 = vld [vmem:[%s740_s0 + $0x20] sm:$0xff] }
   0x3   :  { %179 = vmax.xlane.f32.xlu1 %v178_v3  ;;  %173 = vmax.xlane.f32.xlu0 %v172_v4  ;;  %v175_v8 = vsel %vm147_vm0, %v548_v5, -inf  ;;  %v557_v9 = vld [vmem:[%s740_s0 + $0x28] sm:$0xff] }
   0x4   :  { %7 = vsyncpa [#allocation4], 0  ;;  %v187_v11 = vsel %vm147_vm0, %v557_v9, -inf  ;;  %v184_v12 = vsel %vm147_vm0, %v562_v10, -inf  ;;  %v571_v13 = vld [vmem:[%s740_s0 + $0x38] sm:$0xff]  ;;  %v576_v14 = vld [vmem:[%s740_s0 + $0x30] sm:$0xff]  ;;  %v105_v33 = vlaneseq }
   0x5   :  { %v193_v15 = vsel %vm147_vm0, %v571_v13, -inf  ;;  %v190_v16 = vsel %vm147_vm0, %v576_v14, -inf  ;;  %v98_v17 = vld [vmem:[%s741_s1 + $0x8] sm:$0xff]  ;;  %v99_v18 = vld [vmem:[%s741_s1 + $0x10] sm:$0xff]  ;;  %v97_v19 = vld [vmem:[%s741_s1] sm:$0xff]  ;;  %v263_v25 = vsel %vm147_vm0, %v548_v5, 0.0 }
   0x6   :  { %v100_v20 = vld [vmem:[%s741_s1 + $0x18] sm:$0xff]  ;;  %v101_v21 = vld [vmem:[%s741_s1 + $0x20] sm:$0xff]  ;;  %v102_v22 = vld [vmem:[%s741_s1 + $0x28] sm:$0xff]  ;;  %v260_v26 = vsel %vm147_vm0, %v534_v1, 0.0  ;;  %v630_v39 = vand.u32 127, %v105_v33  ;;  %vm80_vm7 = vcmask 7168  }
   0x7   :  { %182 = vmax.xlane.f32.xlu1 %v181_v7  ;;  %176 = vmax.xlane.f32.xlu0 %v175_v8  ;;  %v103_v23 = vld [vmem:[%s741_s1 + $0x30] sm:$0xff]  ;;  %v104_v24 = vld [vmem:[%s741_s1 + $0x38] sm:$0xff]  ;;  %v509_v33 = vmov 0.0   ;;  %s510_s1 = smov [#allocation3]   ;;  %vm417_vm10 = vcmask 0  }
   0x8   :  { %81 = vst.msk [vmem:[#allocation2] sm:$0xff] %vm80_vm7, %v509_v33  ;;  %82 = vst.msk [vmem:[#allocation2 + $0x8] sm:$0xff] %vm80_vm7, %v509_v33  ;;  %s425_s12 = sshll.u32 %s510_s1, 4  ;;  %s426_s12 = int_to_ptr.vmem [resolvable:$true] %s425_s12 }
   0x9   :  { %83 = vst.msk [vmem:[#allocation2 + $0x10] sm:$0xff] %vm80_vm7, %v509_v33  ;;  %84 = vst.msk [vmem:[#allocation2 + $0x18] sm:$0xff] %vm80_vm7, %v509_v33  ;;  %s484_s14 = scalar_lea.vmem %s426_s12, 16  ;;  %s488_s15 = scalar_lea.vmem %s426_s12, 32 }
   0xa   :  { %85 = vst.msk [vmem:[#allocation2 + $0x20] sm:$0xff] %vm80_vm7, %v509_v33  ;;  %86 = vst.msk [vmem:[#allocation2 + $0x28] sm:$0xff] %vm80_vm7, %v509_v33  ;;  %p485_p0 = scmp.ne.s32.totalorder %s426_s12, %s484_s14  ;;  %p489_p1 = scmp.lt.s32.totalorder %s426_s12, %s426_s12 }
   0xb   :  { %188 = vmax.xlane.f32.xlu1 %v187_v11  ;;  %185 = vmax.xlane.f32.xlu0 %v184_v12  ;;  %87 = vst.msk [vmem:[#allocation2 + $0x30] sm:$0xff] %vm80_vm7, %v509_v33  ;;  %88 = vst.msk [vmem:[#allocation2 + $0x38] sm:$0xff] %vm80_vm7, %v509_v33  ;;  %p490_p2 = scmp.lt.s32.totalorder %s488_s15, %s484_s14 }
   0xd   :  { %p491_p3 = por %p490_p2, %p489_p1 }
   0xf   :  { %194 = vmax.xlane.f32.xlu1 %v193_v15  ;;  %191 = vmax.xlane.f32.xlu0 %v190_v16  ;;  %p492_p4 = pnand %p491_p3, %p485_p0 }
  0x20   :  { %111 = vperm.xlu1 %451, %v98_v17  }
  0x24   :  { %114 = vperm.xlu1 %451, %v99_v18  }
  0x25   :  { %108 = vperm.xlu0 %450, %v97_v19  }
  0x28   :  { %117 = vperm.xlu1 %451, %v100_v20  }
  0x2c   :  { %120 = vperm.xlu1 %451, %v101_v21  }
  0x30   :  { %123 = vperm.xlu1 %451, %v102_v22  }
  0x34   :  { %126 = vperm.xlu1 %451, %v103_v23  }
  0x38   :  { %129 = vperm.xlu1 %451, %v104_v24  }
  0x44   :  { %264 = vadd.xlane.f32.xlu0 %v263_v25 }
  0x5c   :  { %261 = vadd.xlane.f32.xlu1 %v260_v26 }
  0x90   :  { %v610_v27 = vpop.xlane.xlu1 %179  ;;  %v612_v28 = vpop.xlane.xlu0 %173 }
  0x91   :  { %v196_v32 = vsub.f32 %v534_v1, %v612_v28  ;;  %v198_v36 = vsub.f32 %v529_v0, %v610_v27 }
  0x93   :  { %v204_v38 = vmul.f32 1.442695, %v196_v32  ;;  %v208_v42 = vmul.f32 1.442695, %v198_v36  ;;  %v266_v32 = vsel %vm147_vm0, %v529_v0, 0.0  ;;  %v269_v36 = vsel %vm147_vm0, %v539_v2, 0.0 }
  0x94   :  { %v614_v29 = vpop.xlane.xlu1 %182  ;;  %v616_v30 = vpop.xlane.xlu0 %176 }
  0x95   :  { %v197_v34 = vsub.f32 %v548_v5, %v616_v30  ;;  %v199_v40 = vsub.f32 %v539_v2, %v614_v29  ;;  %452 = vpow2.f32 %v204_v38 }
  0x97   :  { %v206_v41 = vmul.f32 1.442695, %v197_v34  ;;  %v210_v46 = vmul.f32 1.442695, %v199_v40 }
  0x98   :  { %v618_v31 = vpop.xlane.xlu1 %188  ;;  %v624_v35 = vpop.xlane.xlu0 %185 }
  0x99   :  { %v201_v45 = vsub.f32 %v557_v9, %v618_v31  ;;  %454 = vpow2.f32 %v206_v41  ;;  %v200_v47 = vsub.f32 %v562_v10, %v624_v35 }
  0x9a   :  { %456 = vpow2.f32 %v208_v42  ;;  %v272_v42 = vsel %vm147_vm0, %v562_v10, 0.0 }
  0x9b   :  { %v214_v52 = vmul.f32 1.442695, %v201_v45  ;;  %458 = vpow2.f32 %v210_v46  ;;  %v212_v54 = vmul.f32 1.442695, %v200_v47  ;;  %v281_v47 = vsel %vm147_vm0, %v571_v13, 0.0 }
  0x9c   :  { %v628_v37 = vpop.xlane.xlu1 %194  ;;  %v634_v43 = vpop.xlane.xlu0 %191 }
  0x9d   :  { %v203_v53 = vsub.f32 %v571_v13, %v628_v37  ;;  %v202_v55 = vsub.f32 %v576_v14, %v634_v43  ;;  %460 = vpow2.f32 %v214_v52 }
  0x9e   :  { %462 = vpow2.f32 %v212_v54 }
  0x9f   :  { %v218_v60 = vmul.f32 1.442695, %v203_v53  ;;  %v216_v61 = vmul.f32 1.442695, %v202_v55  ;;  %v453_v63 = vpop.eup %452 }
  0xa0   :  { %v112_v44 = vpop.permute.xlu1 %111  ;;  %v220_v6 = vsel %vm147_vm0, %v453_v63, 0.0 }
  0xa1   :  { %vm132_vm1 = vcmp.eq.s32.totalorder %v630_v39, %v112_v44  ;;  %464 = vpow2.f32 %v218_v60 }
  0xa2   :  { %v140_v48 = vsel %vm132_vm1, %v548_v5, 0.0  ;;  %466 = vpow2.f32 %v216_v61 }
  0xa3   :  { %v151_v49 = vsel %vm147_vm0, %v140_v48, 0.0 }
  0xa4   :  { %v115_v50 = vpop.permute.xlu1 %114  ;;  %152 = vadd.xlane.f32.xlu1 %v151_v49  ;;  %v109_v51 = vpop.permute.xlu0 %108 }
  0xa5   :  { %vm133_vm2 = vcmp.eq.s32.totalorder %v630_v39, %v115_v50  ;;  %vm131_vm3 = vcmp.eq.s32.totalorder %v630_v39, %v109_v51 }
  0xa6   :  { %v139_v56 = vsel %vm131_vm3, %v534_v1, 0.0  ;;  %v141_v59 = vsel %vm133_vm2, %v529_v0, 0.0  ;;  %v455_v1 = vpop.eup %454 }
  0xa7   :  { %v148_v57 = vsel %vm147_vm0, %v139_v56, 0.0  ;;  %v154_v4 = vsel %vm147_vm0, %v141_v59, 0.0  ;;  %v457_v5 = vpop.eup %456  ;;  %v223_v7 = vsel %vm147_vm0, %v455_v1, 0.0 }
  0xa8   :  { %v118_v58 = vpop.permute.xlu1 %117  ;;  %149 = vadd.xlane.f32.xlu0 %v148_v57  ;;  %v459_v8 = vpop.eup %458  ;;  %v226_v16 = vsel %vm147_vm0, %v457_v5, 0.0 }
  0xa9   :  { %vm134_vm4 = vcmp.eq.s32.totalorder %v630_v39, %v118_v58  ;;  %v461_v12 = vpop.eup %460  ;;  %v229_v15 = vsel %vm147_vm0, %v459_v8, 0.0 }
  0xaa   :  { %v142_v62 = vsel %vm134_vm4, %v539_v2, 0.0  ;;  %v463_v17 = vpop.eup %462  ;;  %v235_v20 = vsel %vm147_vm0, %v461_v12, 0.0  ;;  %v275_v2 = vsel %vm147_vm0, %v557_v9, 0.0 }
  0xab   :  { %v157_v3 = vsel %vm147_vm0, %v142_v62, 0.0  ;;  %v465_v19 = vpop.eup %464  ;;  %v232_v21 = vsel %vm147_vm0, %v463_v17, 0.0 }
  0xac   :  { %158 = vadd.xlane.f32.xlu1 %v157_v3  ;;  %155 = vadd.xlane.f32.xlu0 %v154_v4  ;;  %v121_v11 = vpop.permute.xlu1 %120  ;;  %v467_v22 = vpop.eup %466  ;;  %v241_v23 = vsel %vm147_vm0, %v465_v19, 0.0 }
  0xad   :  { %vm135_vm5 = vcmp.eq.s32.totalorder %v630_v39, %v121_v11  ;;  %v238_v24 = vsel %vm147_vm0, %v467_v22, 0.0 }
  0xae   :  { %v143_v26 = vsel %vm135_vm5, %v562_v10, 0.0 }
  0xaf   :  { %v160_v0 = vsel %vm147_vm0, %v143_v26, 0.0 }
  0xb0   :  { %221 = vadd.xlane.f32.xlu1 %v220_v6  ;;  %224 = vadd.xlane.f32.xlu0 %v223_v7  ;;  %v124_v18 = vpop.permute.xlu1 %123 }
  0xb1   :  { %vm136_vm6 = vcmp.eq.s32.totalorder %v630_v39, %v124_v18 }
  0xb2   :  { %v144_v34 = vsel %vm136_vm6, %v557_v9, 0.0 }
  0xb3   :  { %v163_v40 = vsel %vm147_vm0, %v144_v34, 0.0 }
  0xb4   :  { %230 = vadd.xlane.f32.xlu1 %v229_v15  ;;  %227 = vadd.xlane.f32.xlu0 %v226_v16  ;;  %v127_v25 = vpop.permute.xlu1 %126 }
  0xb5   :  { %vm137_vm8 = vcmp.eq.s32.totalorder %v630_v39, %v127_v25 }
  0xb6   :  { %v145_v41 = vsel %vm137_vm8, %v576_v14, 0.0 }
  0xb7   :  { %v166_v44 = vsel %vm147_vm0, %v145_v41, 0.0 }
  0xb8   :  { %236 = vadd.xlane.f32.xlu1 %v235_v20  ;;  %233 = vadd.xlane.f32.xlu0 %v232_v21  ;;  %v130_v38 = vpop.permute.xlu1 %129 }
  0xb9   :  { %vm138_vm9 = vcmp.eq.s32.totalorder %v630_v39, %v130_v38  ;;  %v278_v39 = vsel %vm147_vm0, %v576_v14, 0.0 }
  0xba   :  { %v146_v45 = vsel %vm138_vm9, %v571_v13, 0.0 }
  0xbb   :  { %v169_v46 = vsel %vm147_vm0, %v146_v45, 0.0 }
  0xbc   :  { %242 = vadd.xlane.f32.xlu1 %v241_v23  ;;  %239 = vadd.xlane.f32.xlu0 %v238_v24 }
  0xc0   :  { %161 = vadd.xlane.f32.xlu1 %v160_v0  ;;  %267 = vadd.xlane.f32.xlu0 %v266_v32 }
  0xc4   :  { %164 = vadd.xlane.f32.xlu1 %v163_v40  ;;  %270 = vadd.xlane.f32.xlu0 %v269_v36 }
  0xc8   :  { %167 = vadd.xlane.f32.xlu1 %v166_v44  ;;  %273 = vadd.xlane.f32.xlu0 %v272_v42 }
  0xcc   :  { %170 = vadd.xlane.f32.xlu1 %v169_v46  ;;  %276 = vadd.xlane.f32.xlu0 %v275_v2  ;;  %v356_v2 = vld [vmem:[#allocation2] sm:$0xff] }
  0xd0   :  { %282 = vadd.xlane.f32.xlu1 %v281_v47  ;;  %279 = vadd.xlane.f32.xlu0 %v278_v39 }
  0xd1   :  { %v265_v48 = vpop.xlane.xlu0 %264 }
  0xe9   :  { %v262_v10 = vpop.xlane.xlu1 %261 }
 0x131   :  { %v153_v49 = vpop.xlane.xlu1 %152 }
 0x132   :  { %v317_v63 = vsub.f32 %v153_v49, %v616_v30  ;;  %v357_v49 = vld [vmem:[#allocation2 + $0x8] sm:$0xff] }
 0x135   :  { %v150_v50 = vpop.xlane.xlu0 %149 }
 0x136   :  { %v316_v61 = vsub.f32 %v150_v50, %v612_v28 }
 0x139   :  { %v159_v51 = vpop.xlane.xlu1 %158  ;;  %v156_v52 = vpop.xlane.xlu0 %155 }
 0x13a   :  { %v319_v16 = vsub.f32 %v159_v51, %v614_v29  ;;  %v318_v19 = vsub.f32 %v156_v52, %v610_v27 }
 0x13d   :  { %v222_v53 = vpop.xlane.xlu1 %221  ;;  %v225_v9 = vpop.xlane.xlu0 %224 }
 0x13e   :  { %468 = vlog2.f32 %v222_v53 }
 0x13f   :  { %470 = vlog2.f32 %v225_v9 }
 0x141   :  { %v231_v54 = vpop.xlane.xlu1 %230  ;;  %v228_v55 = vpop.xlane.xlu0 %227 }
 0x142   :  { %472 = vlog2.f32 %v231_v54 }
 0x143   :  { %474 = vlog2.f32 %v228_v55 }
 0x145   :  { %v237_v13 = vpop.xlane.xlu1 %236  ;;  %v234_v56 = vpop.xlane.xlu0 %233 }
 0x146   :  { %476 = vlog2.f32 %v237_v13 }
 0x147   :  { %478 = vlog2.f32 %v234_v56 }
 0x148   :  { %v469_v14 = vpop.eup %468 }
 0x149   :  { %v471_v57 = vpop.eup %470  ;;  %v245_v58 = vmul.f32 0.6931472, %v469_v14  ;;  %v243_v59 = vpop.xlane.xlu1 %242 }
 0x14a   :  { %v240_v60 = vpop.xlane.xlu0 %239  ;;  %v247_v62 = vmul.f32 0.6931472, %v471_v57  ;;  %480 = vlog2.f32 %v243_v59 }
 0x14b   :  { %v284_v3 = vadd.f32 %v245_v58, %v612_v28  ;;  %482 = vlog2.f32 %v240_v60  ;;  %v324_v1 = vsub.f32 %v316_v61, %v245_v58  ;;  %v359_v61 = vld [vmem:[#allocation2 + $0x18] sm:$0xff] }
 0x14c   :  { %v473_v4 = vpop.eup %472  ;;  %v285_v5 = vadd.f32 %v247_v62, %v616_v30  ;;  %v325_v8 = vsub.f32 %v317_v63, %v247_v62 }
 0x14d   :  { %v475_v6 = vpop.eup %474  ;;  %v292_v7 = vmul.f32 16.0, %v284_v3  ;;  %v251_v11 = vmul.f32 0.6931472, %v473_v4  ;;  %v162_v12 = vpop.xlane.xlu1 %161  ;;  %v332_v22 = vmul.f32 0.98933333, %v324_v1 }
 0x14e   :  { %v268_v15 = vpop.xlane.xlu0 %267  ;;  %v293_v17 = vmul.f32 16.0, %v285_v5  ;;  %v249_v18 = vmul.f32 0.6931472, %v475_v6  ;;  %v333_v32 = vmul.f32 0.98933333, %v325_v8  ;;  %v320_v44 = vsub.f32 %v162_v12, %v624_v35  ;;  %v358_v8 = vld [vmem:[#allocation2 + $0x10] sm:$0xff] }
 0x14f   :  { %v300_v20 = vsub.f32 %v262_v10, %v292_v7  ;;  %v287_v28 = vadd.f32 %v251_v11, %v614_v29  ;;  %v327_v24 = vsub.f32 %v319_v16, %v251_v11 }
 0x150   :  { %v477_v21 = vpop.eup %476  ;;  %v301_v23 = vsub.f32 %v265_v48, %v293_v17  ;;  %v286_v30 = vadd.f32 %v249_v18, %v610_v27  ;;  %v326_v38 = vsub.f32 %v318_v19, %v249_v18 }
 0x151   :  { %v479_v25 = vpop.eup %478  ;;  %v308_v26 = vmul.f32 0.00066666666, %v300_v20  ;;  %v165_v33 = vpop.xlane.xlu1 %164  ;;  %v295_v0 = vmul.f32 16.0, %v287_v28  ;;  %v255_v47 = vmul.f32 0.6931472, %v477_v21 }
 0x152   :  { %v271_v34 = vpop.xlane.xlu0 %270  ;;  %v309_v36 = vmul.f32 0.00066666666, %v301_v23  ;;  %v253_v40 = vmul.f32 0.6931472, %v479_v25  ;;  %v294_v41 = vmul.f32 16.0, %v286_v30  ;;  %v321_v56 = vsub.f32 %v165_v33, %v618_v31 }
 0x153   :  { %v340_v42 = vadd.f32 %v332_v22, %v308_v26  ;;  %v303_v29 = vsub.f32 %v271_v34, %v295_v0  ;;  %v335_v27 = vmul.f32 0.98933333, %v327_v24  ;;  %v334_v13 = vmul.f32 0.98933333, %v326_v38 }
 0x154   :  { %v481_v45 = vpop.eup %480  ;;  %v341_v46 = vadd.f32 %v333_v32, %v309_v36  ;;  %v302_v39 = vsub.f32 %v268_v15, %v294_v41  ;;  %v288_v53 = vadd.f32 %v253_v40, %v624_v35  ;;  %v328_v57 = vsub.f32 %v320_v44, %v253_v40  ;;  %v361_v44 = vld [vmem:[#allocation2 + $0x28] sm:$0xff] }
 0x155   :  { %v483_v10 = vpop.eup %482  ;;  %v348_v48 = vsub.f32 0.0, %v340_v42  ;;  %v259_v50 = vmul.f32 0.6931472, %v481_v45  ;;  %v311_v51 = vmul.f32 0.00066666666, %v303_v29  ;;  %v168_v52 = vpop.xlane.xlu1 %167  ;;  %v289_v3 = vadd.f32 %v255_v47, %v618_v31 }
 0x156   :  { %v274_v9 = vpop.xlane.xlu0 %273  ;;  %v349_v54 = vsub.f32 0.0, %v341_v46  ;;  %v257_v55 = vmul.f32 0.6931472, %v483_v10  ;;  %v310_v58 = vmul.f32 0.00066666666, %v302_v39  ;;  %v322_v62 = vsub.f32 %v168_v52, %v634_v43  ;;  %v363_v39 = vld [vmem:[#allocation2 + $0x38] sm:$0xff] }
 0x157   :  { %v364_v14 = vadd.f32 %v356_v2, %v348_v48  ;;  %v343_v59 = vadd.f32 %v335_v27, %v311_v51  ;;  %v296_v63 = vmul.f32 16.0, %v288_v53  ;;  %v291_v6 = vadd.f32 %v259_v50, %v628_v37  ;;  %v362_v51 = vld [vmem:[#allocation2 + $0x30] sm:$0xff] }
 0x158   :  { %v365_v60 = vadd.f32 %v357_v49, %v349_v54  ;;  %v342_v35 = vadd.f32 %v334_v13, %v310_v58  ;;  %v290_v7 = vadd.f32 %v257_v55, %v634_v43  ;;  %v329_v11 = vsub.f32 %v321_v56, %v255_v47 }
 0x159   :  { %373 = vst.msk [vmem:[#allocation2] sm:$0xff] %vm80_vm7, %v364_v14  ;;  %v351_v4 = vsub.f32 0.0, %v343_v59  ;;  %v171_v1 = vpop.xlane.xlu1 %170  ;;  %v304_v12 = vsub.f32 %v274_v9, %v296_v63  ;;  %v297_v16 = vmul.f32 16.0, %v289_v3  ;;  %v336_v17 = vmul.f32 0.98933333, %v328_v57 }
 0x15a   :  { %v277_v5 = vpop.xlane.xlu0 %276  ;;  %374 = vst.msk [vmem:[#allocation2 + $0x8] sm:$0xff] %vm80_vm7, %v365_v60  ;;  %v323_v15 = vsub.f32 %v171_v1, %v628_v37  ;;  %v350_v31 = vsub.f32 0.0, %v342_v35  ;;  %v299_v21 = vmul.f32 16.0, %v291_v6  ;;  %v330_v23 = vsub.f32 %v322_v62, %v257_v55  ;;  %v360_v37 = vld [vmem:[#allocation2 + $0x20] sm:$0xff] }
 0x15b   :  { %v367_v18 = vadd.f32 %v359_v61, %v351_v4  ;;  %v312_v19 = vmul.f32 0.00066666666, %v304_v12  ;;  %v305_v28 = vsub.f32 %v277_v5, %v297_v16  ;;  %v298_v24 = vmul.f32 16.0, %v290_v7 }
 0x15c   :  { %v331_v20 = vsub.f32 %v323_v15, %v259_v50  ;;  %v366_v22 = vadd.f32 %v358_v8, %v350_v31  ;;  %v337_v25 = vmul.f32 0.98933333, %v329_v11  ;;  %v338_v42 = vmul.f32 0.98933333, %v330_v23 }
 0x15d   :  { %376 = vst.msk [vmem:[#allocation2 + $0x18] sm:$0xff] %vm80_vm7, %v367_v18  ;;  %v283_v43 = vpop.xlane.xlu1 %282  ;;  %v344_v26 = vadd.f32 %v336_v17, %v312_v19  ;;  %v313_v32 = vmul.f32 0.00066666666, %v305_v28 }
 0x15e   :  { %v280_v30 = vpop.xlane.xlu0 %279  ;;  %v307_v33 = vsub.f32 %v283_v43, %v299_v21  ;;  %375 = vst.msk [vmem:[#allocation2 + $0x10] sm:$0xff] %vm80_vm7, %v366_v22  ;;  %v339_v36 = vmul.f32 0.98933333, %v331_v20 }
 0x15f   :  { %v306_v0 = vsub.f32 %v280_v30, %v298_v24  ;;  %v352_v34 = vsub.f32 0.0, %v344_v26  ;;  %v345_v38 = vadd.f32 %v337_v25, %v313_v32 }
 0x160   :  { %v315_v40 = vmul.f32 0.00066666666, %v307_v33  ;;  %v384_v41 = vld [vmem:[#allocation2] sm:$0xff] }
 0x161   :  { %v314_v29 = vmul.f32 0.00066666666, %v306_v0  ;;  %v385_v45 = vld [vmem:[#allocation2 + $0x8] sm:$0xff]  ;;  %v368_v2 = vadd.f32 %v360_v37, %v352_v34  ;;  %v353_v46 = vsub.f32 0.0, %v345_v38  ;;  %v392_v10 = vsel %vm80_vm7, %v384_v41, 0.0 }
 0x162   :  { %v347_v47 = vadd.f32 %v339_v36, %v315_v40  ;;  %v393_v48 = vsel %vm80_vm7, %v385_v45, 0.0 }
 0x163   :  { %v346_v27 = vadd.f32 %v338_v42, %v314_v29  ;;  %377 = vst.msk [vmem:[#allocation2 + $0x20] sm:$0xff] %vm80_vm7, %v368_v2  ;;  %v369_v49 = vadd.f32 %v361_v44, %v353_v46  ;;  %v394_v55 = vadd.f32 %v393_v48, %v392_v10 }
 0x164   :  { %v355_v50 = vsub.f32 0.0, %v347_v47  ;;  %v387_v54 = vld [vmem:[#allocation2 + $0x18] sm:$0xff] }
 0x165   :  { %v354_v52 = vsub.f32 0.0, %v346_v27  ;;  %378 = vst.msk [vmem:[#allocation2 + $0x28] sm:$0xff] %vm80_vm7, %v369_v49  ;;  %v386_v9 = vld [vmem:[#allocation2 + $0x10] sm:$0xff]  ;;  %v397_v57 = vsel %vm80_vm7, %v387_v54, 0.0 }
 0x166   :  { %v371_v53 = vadd.f32 %v363_v39, %v355_v50  ;;  %v395_v56 = vsel %vm80_vm7, %v386_v9, 0.0 }
 0x167   :  { %v370_v13 = vadd.f32 %v362_v51, %v354_v52  ;;  %v396_v14 = vadd.f32 %v395_v56, %v394_v55 }
 0x168   :  { %380 = vst.msk [vmem:[#allocation2 + $0x38] sm:$0xff] %vm80_vm7, %v371_v53 }
 0x169   :  { %379 = vst.msk [vmem:[#allocation2 + $0x30] sm:$0xff] %vm80_vm7, %v370_v13  ;;  %v398_v58 = vadd.f32 %v397_v57, %v396_v14 }
 0x16a   :  { %v388_v59 = vld [vmem:[#allocation2 + $0x20] sm:$0xff] }
 0x16b   :  { %v399_v60 = vsel %vm80_vm7, %v388_v59, 0.0 }
 0x16c   :  { %v389_v61 = vld [vmem:[#allocation2 + $0x28] sm:$0xff]  ;;  %v400_v62 = vadd.f32 %v399_v60, %v398_v58 }
 0x16d   :  { %v401_v63 = vsel %vm80_vm7, %v389_v61, 0.0 }
 0x16e   :  { %v402_v4 = vadd.f32 %v401_v63, %v400_v62 }
 0x16f   :  { %v391_v35 = vld [vmem:[#allocation2 + $0x38] sm:$0xff] }
 0x170   :  { %v390_v3 = vld [vmem:[#allocation2 + $0x30] sm:$0xff]  ;;  %v405_v6 = vsel %vm80_vm7, %v391_v35, 0.0 }
 0x171   :  { %v403_v1 = vsel %vm80_vm7, %v390_v3, 0.0 }
 0x172   :  { %v404_v5 = vadd.f32 %v403_v1, %v402_v4 }
 0x174   :  { %v406_v7 = vadd.f32 %v405_v6, %v404_v5 }
 0x176   :  { %407 = vadd.xlane.f32.xlu0 %v406_v7 }
 0x203   :  { %v408_v8 = vpop.xlane.xlu0 %407 }
 0x204   :  { %v409_v11 = vrot.slane %v408_v8, 4 }
 0x206   :  { %v410_v12 = vadd.f32 %v409_v11, %v408_v8 }
 0x208   :  { %v411_v15 = vrot.slane %v410_v12, 2 }
 0x20a   :  { %v412_v16 = vadd.f32 %v411_v15, %v410_v12 }
 0x20c   :  { %v413_v17 = vrot.slane %v412_v16, 1 }
 0x20e   :  { %v414_v31 = vadd.f32 %v413_v17, %v412_v16 }
 0x210   :  { %445 = vpush %v414_v31 }
 0x241   :  { %s446_s13 = spop %445 }
 0x242   :  { %v416_v18 = vstv %s446_s13 }
 0x243   :  { %418 = vst.msk [vmem:[#allocation3] sm:$0x1] %vm417_vm10, %v416_v18 }
 0x244   :  { %495 = shalt.err (!%p492_p4)
}
 0x245   :  { %s496_s18 = scalar_lea.hbm %s742_s2, 16 }
 0x246   :  { %p497_p5 = scmp.ne.s32.totalorder %s742_s2, %s496_s18  ;;  %p500_p6 = scmp.lt.u32.totalorder %s496_s18, %s742_s2 }
 0x248   :  { %p502_p7 = pnand %p500_p6, %p497_p5 }
 0x24a   :  { %505 = shalt.err (!%p502_p7)
}
 0x24b   :  { %428 = dma.vmem_to_hbm [thread:$0]  %s426_s12, 16, %s742_s2, [#allocation4]  }
 0x24c   :  { %506 = dma.done.wait [#allocation4], 16  }
 0x24d   :  { %507 = vsyncadd [#allocation4], 4294967280 }
 0x24e   :  { %432 = vsyncpa [#allocation4], 1 }

</bundles_post_ra>
